<compile_context>
chip_gen: v5e
topology: v5e:2x2
jax: 0.10.0
libtpu: 0.0.40
codegen_flags: <defaults>
</compile_context>

<pallas_src>
import numpy as np
import jax
import jax.numpy as jnp
from jax import lax
from jax.experimental import pallas as pl
from jax.experimental.pallas import tpu as pltpu


FILTER_SIZES = [3, 5, 7, 10, 20]


def _channel_conv_kernel(x_ref, w_ref, b_ref, o_ref):
    # x_ref: (2, KC, TILE)  parity-major im2col slab (pool pair p in {0,1})
    # w_ref: (Cout, KC)     folded effective conv weights
    # b_ref: (Cout, 1)      folded effective bias
    # o_ref: (Cout, TILE)   pooled output lanes
    w = w_ref[...]
    a0 = jnp.dot(w, x_ref[0], preferred_element_type=jnp.float32)
    a1 = jnp.dot(w, x_ref[1], preferred_element_type=jnp.float32)
    # MaxPool2D((2,1)) then bias (max(a+b, c+b) == max(a,c)+b) — one VPU add.
    o_ref[...] = (jnp.maximum(a0, a1) + b_ref[...]).astype(o_ref.dtype)


def _forward_impl(x, conv_weights, conv_biases, arch_weights):
    """x: (B, Cin, H, W) float32 NCHW.  Returns (B, Cout, H//2, W)."""
    B, Cin, H, W = x.shape
    Cout = conv_weights[0].shape[0]
    K = max(FILTER_SIZES)
    pad_left = (K - 1) // 2          # PyTorch 'same': extra pad goes on the right
    pad_right = (K - 1) - pad_left
    H2 = H // 2                      # floor mode (matches MaxPool2d default)
    KC = K * Cin
    N_pool = B * H2 * W
    assert Cout % 8 == 0, "output sublane dim must stay a multiple of 8"
    assert KC % 8 == 0

    # ---- Fold arch weights into one effective K-tap kernel + bias. ----
    eff_w = jnp.zeros((K, Cout, Cin), jnp.float32)
    for i, (f, Wf) in enumerate(zip(FILTER_SIZES, conv_weights)):
        aw = arch_weights[i]
        left_f = (f - 1) // 2
        start = pad_left - left_f
        # Wf: (Cout, Cin, f, 1) -> per-tap (Cout, Cin), placed at aligned taps.
        eff_w = eff_w.at[start:start + f].add(
            aw * jnp.transpose(Wf[:, :, :, 0], (2, 0, 1)))
    lhs = jnp.transpose(eff_w, (1, 0, 2)).reshape(Cout, KC)       # (Cout, KC)
    eff_b = (jnp.stack(conv_biases).T @ arch_weights).astype(jnp.float32)
    eff_b = eff_b.reshape(Cout, 1)                                 # (Cout, 1)

    # ---- im2col RHS: (2, KC, B*H2*W), parity-major leading axis. ----
    x_pad = jnp.pad(x.astype(jnp.float32),
                    ((0, 0), (0, 0), (pad_left, pad_right), (0, 0)))
    # K shifted H-windows: window j row h == x_pad row h + j.
    wins = jnp.stack([x_pad[:, :, j:j + H, :] for j in range(K)], axis=0)
    wins = wins[:, :, :, :2 * H2, :]                # (K,B,Cin,2*H2,W), drop odd row
    wins = wins.reshape(K, B, Cin, H2, 2, W)        # split h -> (h2, parity)
    wins = jnp.transpose(wins, (4, 0, 2, 1, 3, 5))  # (2, K, Cin, B, H2, W)
    rhs = wins.reshape(2, KC, N_pool)               # col = b*H2*W + h2*W + w

    # 2 "parallel" steps over halves of the pooled lane slab when the width
    # allows (uses both TensorCores on v7x), otherwise a single step.
    n_steps = 2 if (N_pool % 256 == 0) else 1
    tile = N_pool // n_steps

    out = pl.pallas_call(
        _channel_conv_kernel,
        out_shape=jax.ShapeDtypeStruct((Cout, N_pool), jnp.float32),
        grid=(n_steps,),
        in_specs=[
            pl.BlockSpec((2, KC, tile), lambda g: (0, 0, g)),
            pl.BlockSpec((Cout, KC), lambda g: (0, 0)),
            pl.BlockSpec((Cout, 1), lambda g: (0, 0)),
        ],
        out_specs=pl.BlockSpec((Cout, tile), lambda g: (0, g)),
        compiler_params=pltpu.CompilerParams(dimension_semantics=("parallel",)),
    )(rhs, lhs, eff_b)

    # (Cout, B*H2*W) -> (B, Cout, H2, W)
    return jnp.transpose(out.reshape(Cout, B, H2, W), (1, 0, 2, 3))


# Jit the whole forward so the pad/stack/transpose/reshape im2col chain fuses
# with the weight fold and the pallas_call instead of dispatching separately.
channel_conv_forward = jax.jit(_forward_impl)


def reference_forward(x, conv_weights, conv_biases, arch_weights):
    """Faithful per-filter reference (lax conv per filter, weighted sum, maxpool)."""
    B, Cin, H, W = x.shape
    Cout = conv_weights[0].shape[0]
    acc = jnp.zeros((B, Cout, H, W), jnp.float32)
    aw_np = np.asarray(arch_weights)
    for f, Wf, bf, aw in zip(FILTER_SIZES, conv_weights, conv_biases, aw_np):
        left = (f - 1) // 2
        right = (f - 1) - left
        out = lax.conv_general_dilated(
            x, Wf, window_strides=(1, 1),
            padding=((left, right), (0, 0)),
            dimension_numbers=("NCHW", "OIHW", "NCHW"))
        acc = acc + aw * (out + bf.reshape(1, Cout, 1, 1))
    a = np.asarray(acc)
    H2 = H // 2
    return np.maximum(a[:, :, 0:2 * H2:2, :], a[:, :, 1:2 * H2:2, :])


if __name__ == "__main__":
    B, Cin, Cout, H, W = 2, 4, 8, 16, 16

    key = jax.random.PRNGKey(0)
    keys = jax.random.split(key, 1 + 2 * len(FILTER_SIZES))
    x = jax.random.normal(keys[0], (B, Cin, H, W), jnp.float32)

    # Deterministic parameter init (PyTorch Conv2d-style uniform bounds).
    conv_weights, conv_biases = [], []
    for i, f in enumerate(FILTER_SIZES):
        bound = 1.0 / np.sqrt(Cin * f * 1)
        wk, bk = keys[1 + 2 * i], keys[2 + 2 * i]
        conv_weights.append(
            jax.random.uniform(wk, (Cout, Cin, f, 1), jnp.float32, -bound, bound))
        conv_biases.append(
            jax.random.uniform(bk, (Cout,), jnp.float32, -bound, bound))

    # forward(..., weights=None) default: all-ones arch weights.
    arch_weights = jnp.ones((len(FILTER_SIZES),), jnp.float32)

    out = channel_conv_forward(x, conv_weights, conv_biases, arch_weights)
    out = jax.block_until_ready(out)

    assert out.shape == (B, Cout, H // 2, W), out.shape
    ref = reference_forward(x, conv_weights, conv_biases, arch_weights)
    np.testing.assert_allclose(np.asarray(out), ref, rtol=1e-4, atol=1e-4)
    print("KERNEL_OK")
</pallas_src>

<mosaic_0001>
module attributes {stable_mosaic.version = 11 : i64} {
  func.func @_channel_conv_kernel(%arg0: i32, %arg1: memref<2x80x128xf32, #tpu.memory_space<vmem>>, %arg2: memref<8x80xf32, #tpu.memory_space<vmem>>, %arg3: memref<8x1xf32, #tpu.memory_space<vmem>>, %arg4: memref<8x128xf32, #tpu.memory_space<vmem>>) attributes {dimension_semantics = [#tpu.dimension_semantics<parallel>], iteration_bounds = array<i64: 2>, scalar_prefetch = 0 : i64, scratch_operands = 0 : i64, tpu.core_type = #tpu.core_type<tc>, window_params = [{transform_indices = @transform_0, window_bounds = array<i64: 2, 80, 128>}, {pipeline_mode = #tpu.pipeline_mode<synchronous>, transform_indices = @transform_1, window_bounds = array<i64: 8, 80>}, {pipeline_mode = #tpu.pipeline_mode<synchronous>, transform_indices = @transform_2, window_bounds = array<i64: 8, 1>}, {transform_indices = @transform_3, window_bounds = array<i64: 8, 128>}]} {
    %c0 = arith.constant 0 : index
    %c0_0 = arith.constant 0 : index
    %0 = vector.load %arg2[%c0, %c0_0] : memref<8x80xf32, #tpu.memory_space<vmem>>, vector<8x80xf32>
    %c0_1 = arith.constant 0 : index
    %c0_2 = arith.constant 0 : index
    %c0_3 = arith.constant 0 : index
    %1 = vector.load %arg1[%c0_1, %c0_2, %c0_3] : memref<2x80x128xf32, #tpu.memory_space<vmem>>, vector<1x80x128xf32>
    %2 = vector.shape_cast %1 : vector<1x80x128xf32> to vector<80x128xf32>
    %cst = arith.constant dense<0.000000e+00> : vector<8x128xf32>
    %3 = tpu.matmul %0, %2, %cst {dimension_numbers = #tpu.dot_dimension_numbers<[1], [0], [0], [1], [0, 0, 1, 1], [], []>} : vector<8x80xf32>, vector<80x128xf32>, vector<8x128xf32> -> vector<8x128xf32>
    %c1 = arith.constant 1 : index
    %c0_4 = arith.constant 0 : index
    %c0_5 = arith.constant 0 : index
    %4 = vector.load %arg1[%c1, %c0_4, %c0_5] : memref<2x80x128xf32, #tpu.memory_space<vmem>>, vector<1x80x128xf32>
    %5 = vector.shape_cast %4 : vector<1x80x128xf32> to vector<80x128xf32>
    %cst_6 = arith.constant dense<0.000000e+00> : vector<8x128xf32>
    %6 = tpu.matmul %0, %5, %cst_6 {dimension_numbers = #tpu.dot_dimension_numbers<[1], [0], [0], [1], [0, 0, 1, 1], [], []>} : vector<8x80xf32>, vector<80x128xf32>, vector<8x128xf32> -> vector<8x128xf32>
    %7 = arith.maximumf %3, %6 : vector<8x128xf32>
    %c0_7 = arith.constant 0 : index
    %c0_8 = arith.constant 0 : index
    %8 = vector.load %arg3[%c0_7, %c0_8] : memref<8x1xf32, #tpu.memory_space<vmem>>, vector<8x1xf32>
    %9 = vector.broadcast %8 : vector<8x1xf32> to vector<8x128xf32>
    %10 = arith.addf %7, %9 : vector<8x128xf32>
    %c0_9 = arith.constant 0 : index
    %c0_10 = arith.constant 0 : index
    %11 = vector.load %arg4[%c0_9, %c0_10] : memref<8x128xf32, #tpu.memory_space<vmem>>, vector<8x128xf32>
    tpu.vector_store %arg4[%c0_9, %c0_10], %10 {strides = array<i32>} : memref<8x128xf32, #tpu.memory_space<vmem>>, vector<8x128xf32>,
    return
  }
  func.func @transform_0(%arg0: i32) -> (i32, i32, i32) {
    %c0_i32 = arith.constant 0 : i32
    %c0_i32_0 = arith.constant 0 : i32
    %c0_i32_1 = arith.constant 0 : i32
    return %c0_i32, %c0_i32_0, %arg0 : i32, i32, i32
  }
  func.func @transform_1(%arg0: i32) -> (i32, i32) {
    %c0_i32 = arith.constant 0 : i32
    %c0_i32_0 = arith.constant 0 : i32
    %c0_i32_1 = arith.constant 0 : i32
    return %c0_i32, %c0_i32_0 : i32, i32
  }
  func.func @transform_2(%arg0: i32) -> (i32, i32) {
    %c0_i32 = arith.constant 0 : i32
    %c0_i32_0 = arith.constant 0 : i32
    %c0_i32_1 = arith.constant 0 : i32
    return %c0_i32, %c0_i32_0 : i32, i32
  }
  func.func @transform_3(%arg0: i32) -> (i32, i32) {
    %c0_i32 = arith.constant 0 : i32
    %c0_i32_0 = arith.constant 0 : i32
    return %c0_i32, %arg0 : i32, i32
  }
}

</mosaic_0001>

<bundles_post_ra>
// kernel: _forward_impl.1
= control target key start
LH: loop header
LB: loop body
LE: loop exit
PB: predicated region body
PF: predicated region fallthrough
CT: control target
= control target key end

     0   :  { %s508_s12 = smov 0   ;;  %s510_s13 = smov 0   ;;  %s634_s0 = inlined_call_operand.vmem [shape: f32[2,80,256], index: 0, kind: input, shape index: {}]   ;;  %s635_s1 = inlined_call_operand.vmem [shape: f32[8,80], index: 1, kind: input, shape index: {}]   ;;  %s636_s2 = inlined_call_operand.vmem [shape: f32[8,1], index: 2, kind: input, shape index: {}]   ;;  %s637_s3 = inlined_call_operand.vmem [shape: f32[8,256], index: 3, kind: output, shape index: {}]  }
   0x1   :  { %s512_s14 = smov 0  }
   0x2 LB: > { %s414_s15 = sadd.s32 4294967295, %s485_s14   ;;  %s525_s16 = sadd.s32 1, %s485_s14   ;;  %s485_s14 = sphi %s512_s14, %s640_s14   ;;  %s481_s13 = sphi %s510_s13, %s639_s13   ;;  %s477_s12 = sphi %s508_s12, %s638_s12  }
   0x3   : > { %s17_s17 = ssub.s32 %s485_s14, %s525_s16  ;;  %s20_s18 = sadd.s32 1, %s481_s13 }
   0x4   : > { %p18_p0 = scmp.eq.s32.totalorder %s17_s17, 0  ;;  %p27_p1 = scmp.ne.s32.totalorder %s481_s13, %s477_s12 }
   0x5   : > { %p28_p2 = scmp.eq.s32.totalorder %s485_s14, 0  ;;  %p417_p4 = scmp.ge.s32.totalorder %s485_s14, 2 }
   0x6   : > { %s534_s19 = scalar_select %p18_p0, %s481_s13, %s20_s18  }
   0x7   : > { %p29_p3 = por %p28_p2, %p27_p1  ;;  %127 = sbr.rel (%p417_p4) target bundleno = 36 (0x24), region = 24 }
   0xc   : > { %130 = sbr.rel (!%p29_p3) target bundleno = 36 (0x24), region = 28  ;;  %s132_s20 = sand.u32 (%p29_p3), 1, %s481_s13  }
   0xd   : > { %s418_s21 = sshll.u32 (%p29_p3), %s485_s14, 3  ;;  %s435_s22 = smul.u32 (%p29_p3), 160, %s132_s20 }
   0xe   : > { %s542_s25 = scalar_lea.vmem (%p29_p3), %s634_s0, %s418_s21 }
   0xf   : > { %v203_v0 = vld [vmem:[%s542_s25] sm:$0xff] (%p29_p3)  ;;  %v205_v1 = vld [vmem:[%s542_s25 + $0x10] sm:$0xff] (%p29_p3)  ;;  %s547_s26 = scalar_lea.vmem (%p29_p3), [#allocation2], %s435_s22 }
  0x10   : > { %v207_v2 = vld [vmem:[%s542_s25 + $0x20] sm:$0xff] (%p29_p3)  ;;  %204 = vst [vmem:[%s547_s26] sm:$0xff] (%p29_p3), %v203_v0  ;;  %v209_v3 = vld [vmem:[%s542_s25 + $0x30] sm:$0xff] (%p29_p3) }
  0x11   : > { %206 = vst [vmem:[%s547_s26 + $0x8] sm:$0xff] %v205_v1  ;;  %v211_v4 = vld [vmem:[%s542_s25 + $0x40] sm:$0xff]  ;;  %v213_v5 = vld [vmem:[%s542_s25 + $0x50] sm:$0xff] }
  0x12   : > { %208 = vst [vmem:[%s547_s26 + $0x10] sm:$0xff] %v207_v2  ;;  %v215_v6 = vld [vmem:[%s542_s25 + $0x60] sm:$0xff]  ;;  %v217_v7 = vld [vmem:[%s542_s25 + $0x70] sm:$0xff] }
  0x13   : > { %210 = vst [vmem:[%s547_s26 + $0x18] sm:$0xff] %v209_v3  ;;  %v219_v8 = vld [vmem:[%s542_s25 + $0x80] sm:$0xff]  ;;  %v221_v9 = vld [vmem:[%s542_s25 + $0x90] sm:$0xff] }
  0x14   : > { %212 = vst [vmem:[%s547_s26 + $0x20] sm:$0xff] %v211_v4  ;;  %v223_v10 = vld [vmem:[%s542_s25 + $0xa0] sm:$0xff]  ;;  %v225_v11 = vld [vmem:[%s542_s25 + $0xb0] sm:$0xff] }
  0x15   : > { %214 = vst [vmem:[%s547_s26 + $0x28] sm:$0xff] %v213_v5  ;;  %v227_v12 = vld [vmem:[%s542_s25 + $0xc0] sm:$0xff]  ;;  %v229_v13 = vld [vmem:[%s542_s25 + $0xd0] sm:$0xff] }
  0x16   : > { %216 = vst [vmem:[%s547_s26 + $0x30] sm:$0xff] %v215_v6  ;;  %v231_v14 = vld [vmem:[%s542_s25 + $0xe0] sm:$0xff]  ;;  %v233_v15 = vld [vmem:[%s542_s25 + $0xf0] sm:$0xff] }
  0x17   : > { %218 = vst [vmem:[%s547_s26 + $0x38] sm:$0xff] %v217_v7  ;;  %v235_v16 = vld [vmem:[%s542_s25 + $0x100] sm:$0xff]  ;;  %v237_v17 = vld [vmem:[%s542_s25 + $0x110] sm:$0xff] }
  0x18   : > { %220 = vst [vmem:[%s547_s26 + $0x40] sm:$0xff] %v219_v8  ;;  %v239_v18 = vld [vmem:[%s542_s25 + $0x120] sm:$0xff]  ;;  %v241_v19 = vld [vmem:[%s542_s25 + $0x130] sm:$0xff] }
  0x19   : > { %222 = vst [vmem:[%s547_s26 + $0x48] sm:$0xff] %v221_v9 }
  0x1a   : > { %224 = vst [vmem:[%s547_s26 + $0x50] sm:$0xff] %v223_v10 }
  0x1b   : > { %226 = vst [vmem:[%s547_s26 + $0x58] sm:$0xff] %v225_v11 }
  0x1c   : > { %228 = vst [vmem:[%s547_s26 + $0x60] sm:$0xff] %v227_v12 }
  0x1d   : > { %230 = vst [vmem:[%s547_s26 + $0x68] sm:$0xff] %v229_v13 }
  0x1e   : > { %232 = vst [vmem:[%s547_s26 + $0x70] sm:$0xff] %v231_v14 }
  0x1f   : > { %234 = vst [vmem:[%s547_s26 + $0x78] sm:$0xff] %v233_v15 }
  0x20   : > { %236 = vst [vmem:[%s547_s26 + $0x80] sm:$0xff] %v235_v16 }
  0x21   : > { %238 = vst [vmem:[%s547_s26 + $0x88] sm:$0xff] %v237_v17 }
  0x22   : > { %240 = vst [vmem:[%s547_s26 + $0x90] sm:$0xff] %v239_v18 }
  0x23   : > { %242 = vst [vmem:[%s547_s26 + $0x98] sm:$0xff] %v241_v19 }
  0x24 PF: > { %p419_p5 = scmp.ge.s32.totalorder %s485_s14, 1  ;;  %p247_p6 = scmp.lt.s32.totalorder %s485_s14, 3 }
  0x26   : > { %p248_p7 = pnand %p419_p5, %p247_p6 }
  0x27   : > { %s254_s27 = sand.u32 (!%p248_p7), 1, %s477_s12   ;;  %p276_p8 = scmp.lt.s32.totalorder (!%p248_p7), %s414_s15, 1 }
  0x28   : > { %251 = sbr.rel (%p248_p7) target bundleno = 197 (0xc5), region = 66 }
  0x29   : > { %s436_s30 = smul.u32 (!%p248_p7), 160, %s254_s27 }
  0x2b   : > { %s592_s4 = scalar_lea.vmem (!%p248_p7), [#allocation2], %s436_s30 }
  0x2d   : > { %v347_v20 = vld [vmem:[%s636_s2] sm:$0xff]  ;;  %v487_v21 = vmov 0   ;;  %v290_v22 = vld [vmem:[%s592_s4 + $0x48] sm:$0xff]  ;;  %v431_v23 = vld [vmem:[%s592_s4 + $0x98] sm:$0xff]  ;;  %vm291_vm0 = vcmask 654336   ;;  %s642_s15 = smov (!%p276_p8, %s414_s15), 1 }
  0x2e   : > { %462 = vset.pattern.permute.xlu0 %v487_v21  ;;  %v289_v24 = vld [vmem:[%s592_s4 + $0x40] sm:$0xff]  ;;  %301 = vmatpush.msra.mxu0 %v290_v22  ;;  %v430_v25 = vld [vmem:[%s592_s4 + $0x90] sm:$0xff]  ;;  %v288_v26 = vld [vmem:[%s592_s4 + $0x38] sm:$0xff]  ;;  %s420_s7 = sshll.u32 %s642_s15, 3 }
  0x2f   : > { %350 = vperm.xlu0 %462, %v347_v20   ;;  %332 = vmatpush.msra.mxu1 %v431_v23  ;;  %v429_v27 = vld [vmem:[%s592_s4 + $0x88] sm:$0xff]  ;;  %v287_v28 = vld [vmem:[%s592_s4 + $0x30] sm:$0xff]  ;;  %v428_v29 = vld [vmem:[%s592_s4 + $0x80] sm:$0xff]  ;;  %s279_s10 = scalar_lea.vmem %s637_s3, %s420_s7 }
  0x30   : > { %302 = vmatpush.msra.mxu0 %v289_v24  ;;  %v286_v30 = vld [vmem:[%s592_s4 + $0x28] sm:$0xff]  ;;  %v427_v31 = vld [vmem:[%s592_s4 + $0x78] sm:$0xff]  ;;  %v285_v32 = vld [vmem:[%s592_s4 + $0x20] sm:$0xff] }
  0x31   : > { %333 = vmatpush.msra.mxu1 %v430_v25  ;;  %v426_v33 = vld [vmem:[%s592_s4 + $0x70] sm:$0xff]  ;;  %v284_v34 = vld [vmem:[%s592_s4 + $0x18] sm:$0xff]  ;;  %v425_v35 = vld [vmem:[%s592_s4 + $0x68] sm:$0xff] }
  0x32   : > { %303 = vmatpush.msra.mxu0 %v288_v26  ;;  %v283_v36 = vld [vmem:[%s592_s4 + $0x10] sm:$0xff]  ;;  %v424_v37 = vld [vmem:[%s592_s4 + $0x60] sm:$0xff]  ;;  %v282_v38 = vld [vmem:[%s592_s4 + $0x8] sm:$0xff] }
  0x33   : > { %334 = vmatpush.msra.mxu1 %v429_v27  ;;  %v423_v39 = vld [vmem:[%s592_s4 + $0x58] sm:$0xff]  ;;  %v281_v40 = vld [vmem:[%s592_s4] sm:$0xff]  ;;  %v422_v41 = vld [vmem:[%s592_s4 + $0x50] sm:$0xff] }
  0x34   : > { %304 = vmatpush.msra.mxu0 %v287_v28  ;;  %v280_v42 = vld [vmem:[%s635_s1] sm:$0xff] }
  0x35   : > { %335 = vmatpush.msra.mxu1 %v428_v29 }
  0x36   : > { %305 = vmatpush.msra.mxu0 %v286_v30 }
  0x37   : > { %336 = vmatpush.msra.mxu1 %v427_v31 }
  0x38   : > { %306 = vmatpush.msra.mxu0 %v285_v32 }
  0x39   : > { %337 = vmatpush.msra.mxu1 %v426_v33 }
  0x3a   : > { %307 = vmatpush.msra.mxu0 %v284_v34 }
  0x3b   : > { %338 = vmatpush.msra.mxu1 %v425_v35 }
  0x3c   : > { %308 = vmatpush.msra.mxu0 %v283_v36 }
  0x3d   : > { %339 = vmatpush.msra.mxu1 %v424_v37 }
  0x3e   : > { %309 = vmatpush.msra.mxu0 %v282_v38 }
  0x3f   : > { %340 = vmatpush.msra.mxu1 %v423_v39 }
  0x40   : > { %310 = vmatpush.msra.mxu0 %v281_v40 }
  0x41   : > { %341 = vmatpush.msra.mxu1 %v422_v41  ;;  %421 = vmatmul.msk.f32.vlgmr.msra.gmra.mxu0 %vm291_vm0, %v280_v42 }
  0x42   : > { %432 = vmatmul.msk.f32.vlgmr.msra.gmra.mxu1 %vm291_vm0, %v280_v42 }
  0xa1   : > { %v351_v43 = vpop.permute.xlu0 %350 }
  0xbe   : > { %v312_v44 = vpop.f32.mrf.mxu0 }
  0xbf   : > { %v343_v45 = vpop.f32.mrf.mxu1 }
  0xc0   : > { %v346_v46 = vmax.f32 %v312_v44, %v343_v45 }
  0xc2   : > { %v353_v47 = vadd.f32 %v351_v43, %v346_v46 }
  0xc4   : > { %354 = vst [vmem:[%s279_s10] sm:$0xff] %v353_v47 }
  0xc5 PF: > { %p10_p9 = scmp.ge.s32.totalorder %s525_s16, 4   ;;  %s638_s12 = smov %s481_s13 }
  0xc6   : > { %s639_s13 = smov %s534_s19  ;;  %s640_s14 = smov %s525_s16 }
  0xc7   :  { %12 = sbr.rel (!%p10_p9) target bundleno = 2 (0x2), region = 106 }

</bundles_post_ra>
